<compile_context>
chip_gen: v7x
topology: tpu7x:2x2x1
jax: 0.10.0
libtpu: 0.0.40
codegen_flags: <defaults>
</compile_context>

<pallas_src>
import math
import functools

import jax
import jax.numpy as jnp
from jax import lax
from jax.experimental import pallas as pl
from jax.experimental.pallas import tpu as pltpu

_INV_SQRT2 = 0.7071067811865476  # 1/sqrt(2), folded constant for erf-GELU
_LN_EPS = 1e-12


def _round_up(a, b):
    return ((a + b - 1) // b) * b


def _vmem_cap_bytes():
    """Chip-dependent scoped-VMEM budget (keeps headroom below physical)."""
    try:
        kind = jax.devices()[0].device_kind.lower()
    except Exception:
        kind = ""
    if "v5" in kind or "v6" in kind:
        return 100 << 20          # 128 MiB physical VMEM on v5e / v6e
    return 56 << 20               # v7x: 64 MiB physical per TC -> leave margin


def _choose_chunk(h4, target=512):
    """Width of the 4H column chunk processed per inner step (lane-aligned)."""
    if h4 <= target:
        return h4
    for c in (512, 384, 256, 128):
        if h4 % c == 0:
            return c
    return h4                     # awkward size: fall back to a single chunk


def _make_resident_kernel(h, h4, tc4):
    """Weights fully VMEM-resident; the 4H dimension is chunked in-kernel."""
    nchunks = h4 // tc4
    inv_h = 1.0 / h

    def kernel(x_ref, w1_ref, b1_ref, w2_ref, b2_ref, gamma_ref, beta_ref,
               o_ref, acc_ref):
        x = x_ref[...]                          # (tm, H) f32
        xb = x.astype(jnp.bfloat16)             # cast hoisted out of chunk loop
        # residual + dense_2 bias folded into the accumulator init
        acc_ref[...] = x + b2_ref[...]

        # Chunked FFN: never materialize the full (tm, 4H) intermediate.
        for c in range(nchunks):                # static unroll, static slices
            lo = c * tc4
            hc = jnp.dot(xb, w1_ref[:, lo:lo + tc4],
                         preferred_element_type=jnp.float32)
            hc = hc + b1_ref[:, lo:lo + tc4]
            # erf-GELU in f32 (matches PyTorch reference; v5e has no bf16 VPU).
            # TODO(synk): optional bf16 GELU on v6e/v7x behind a flag.
            hc = hc * 0.5 * (1.0 + lax.erf(hc * _INV_SQRT2))
            acc_ref[...] += jnp.dot(hc.astype(jnp.bfloat16),
                                    w2_ref[lo:lo + tc4, :],
                                    preferred_element_type=jnp.float32)

        # One-pass LayerNorm (sum and sum-of-squares together), gamma folded
        # into the rstd multiply; rsqrt runs on the EUP slot.
        hh = acc_ref[...]
        s1 = jnp.sum(hh, axis=-1, keepdims=True)
        s2 = jnp.sum(hh * hh, axis=-1, keepdims=True)
        mean = s1 * inv_h
        var = jnp.maximum(s2 * inv_h - mean * mean, 0.0)
        rstd = lax.rsqrt(var + _LN_EPS)
        o_ref[...] = (hh - mean) * (gamma_ref[...] * rstd) + beta_ref[...]

    return kernel


def _make_streamed_kernel(h):
    """Large-H path: grid axis over 4H chunks, weight slabs streamed from HBM."""
    inv_h = 1.0 / h

    def kernel(x_ref, w1_ref, b1_ref, w2_ref, b2_ref, gamma_ref, beta_ref,
               o_ref, acc_ref):
        c = pl.program_id(1)

        @pl.when(c == 0)
        def _():
            acc_ref[...] = x_ref[...] + b2_ref[...]

        xb = x_ref[...].astype(jnp.bfloat16)
        hc = jnp.dot(xb, w1_ref[...], preferred_element_type=jnp.float32)
        hc = hc + b1_ref[...]
        hc = hc * 0.5 * (1.0 + lax.erf(hc * _INV_SQRT2))
        acc_ref[...] += jnp.dot(hc.astype(jnp.bfloat16), w2_ref[...],
                                preferred_element_type=jnp.float32)

        @pl.when(c == pl.num_programs(1) - 1)
        def _():
            hh = acc_ref[...]
            s1 = jnp.sum(hh, axis=-1, keepdims=True)
            s2 = jnp.sum(hh * hh, axis=-1, keepdims=True)
            mean = s1 * inv_h
            var = jnp.maximum(s2 * inv_h - mean * mean, 0.0)
            rstd = lax.rsqrt(var + _LN_EPS)
            o_ref[...] = (hh - mean) * (gamma_ref[...] * rstd) + beta_ref[...]

    return kernel


@functools.partial(jax.jit, static_argnames=("tm", "stream_weights"))
def intermediate_forward(x, w1, b1, w2, b2, gamma, beta, *, tm=512,
                         stream_weights=None):
    """Fused dense_1 -> GELU -> dense_2 -> (+residual) -> LayerNorm.

    x: [B, S, H] f32.  w1: [H, 4H] (dense_1.weight.T), w2: [4H, H].
    Dropout is identity (inference mode).  Matmul operands are bf16 with f32
    accumulation (numerics differ from a pure-f32 reference by ~bf16 epsilon).
    """
    B, S, H = x.shape
    H4 = w1.shape[1]
    M = B * S

    cap = _vmem_cap_bytes()
    tc4 = _choose_chunk(H4)

    # Row tile: sublane aligned, clamped so there are >= 2 grid steps whenever
    # possible (feeds both TensorCores on v7x via the "parallel" axis).
    M8 = _round_up(M, 8)
    tm_eff = min(tm, M8)
    if M8 > 8:
        tm_eff = min(tm_eff, _round_up((M8 + 1) // 2, 8))
    tm_eff = max(tm_eff, 8)
    M_pad = _round_up(M, tm_eff)

    x2 = x.reshape(M, H).astype(jnp.float32)
    if M_pad != M:
        x2 = jnp.pad(x2, ((0, M_pad - M), (0, 0)))

    # bf16 weights for the MXU (accumulation stays f32 in-kernel).
    w1b = w1.astype(jnp.bfloat16)
    w2b = w2.astype(jnp.bfloat16)
    b1_2 = b1.reshape(1, H4).astype(jnp.float32)
    b2_2 = b2.reshape(1, H).astype(jnp.float32)
    g_2 = gamma.reshape(1, H).astype(jnp.float32)
    be_2 = beta.reshape(1, H).astype(jnp.float32)

    # --- VMEM accounting (Pallas double-buffers every BlockSpec operand) -----
    io_bytes = 2 * 2 * tm_eff * H * 4            # x + out tiles, x2 buffers
    acc_bytes = tm_eff * H * 4                   # f32 accumulator scratch
    chunk_bytes = tm_eff * tc4 * (4 + 2)         # live (tm, tc4) f32 + bf16 copy
    small_bytes = 2 * (H4 + 3 * H) * 4 * 2       # biases / gamma / beta
    margin = 6 << 20
    w_full_bytes = 2 * (H * H4 + H4 * H) * 2     # full bf16 weights, x2 buffers
    w_slab_bytes = 2 * (H * tc4 + tc4 * H) * 2   # streamed slabs, x2 buffers

    resident_need = (w_full_bytes + io_bytes + acc_bytes + chunk_bytes
                     + small_bytes + margin)
    streamed_need = (w_slab_bytes + io_bytes + acc_bytes + chunk_bytes
                     + small_bytes + margin)

    if stream_weights is None:
        use_stream = resident_need > cap
    else:
        use_stream = bool(stream_weights)

    n_row_tiles = M_pad // tm_eff
    weight_bytes = (H * H4 + H4 * H) * 2
    cost = pl.CostEstimate(
        flops=4 * M_pad * H * H4,                       # two matmuls
        transcendentals=M_pad * H4,                     # erf per 4H element
        bytes_accessed=(2 * M_pad * H * 4
                        + weight_bytes * (n_row_tiles if use_stream else 1)
                        + (H4 + 3 * H) * 4))

    if not use_stream:
        grid = (n_row_tiles,)
        kernel = _make_resident_kernel(H, H4, tc4)
        in_specs = [
            pl.BlockSpec((tm_eff, H), lambda i: (i, 0)),      # x tile
            pl.BlockSpec((H, H4), lambda i: (0, 0)),          # w1 (resident)
            pl.BlockSpec((1, H4), lambda i: (0, 0)),          # b1
            pl.BlockSpec((H4, H), lambda i: (0, 0)),          # w2 (resident)
            pl.BlockSpec((1, H), lambda i: (0, 0)),           # b2
            pl.BlockSpec((1, H), lambda i: (0, 0)),           # gamma
            pl.BlockSpec((1, H), lambda i: (0, 0)),           # beta
        ]
        out_spec = pl.BlockSpec((tm_eff, H), lambda i: (i, 0))
        dims = ("parallel",)
        vmem_limit = int(min(cap, max(32 << 20, resident_need)))
    else:
        grid = (n_row_tiles, H4 // tc4)
        kernel = _make_streamed_kernel(H)
        in_specs = [
            pl.BlockSpec((tm_eff, H), lambda i, c: (i, 0)),   # x tile (reused)
            pl.BlockSpec((H, tc4), lambda i, c: (0, c)),      # w1 slab
            pl.BlockSpec((1, tc4), lambda i, c: (0, c)),      # b1 slab
            pl.BlockSpec((tc4, H), lambda i, c: (c, 0)),      # w2 slab
            pl.BlockSpec((1, H), lambda i, c: (0, 0)),        # b2
            pl.BlockSpec((1, H), lambda i, c: (0, 0)),        # gamma
            pl.BlockSpec((1, H), lambda i, c: (0, 0)),        # beta
        ]
        out_spec = pl.BlockSpec((tm_eff, H), lambda i, c: (i, 0))
        dims = ("parallel", "arbitrary")
        vmem_limit = int(min(cap, max(32 << 20, streamed_need)))

    out = pl.pallas_call(
        kernel,
        out_shape=jax.ShapeDtypeStruct((M_pad, H), jnp.float32),
        grid_spec=pltpu.PrefetchScalarGridSpec(
            num_scalar_prefetch=0,
            grid=grid,
            in_specs=in_specs,
            out_specs=out_spec,
            scratch_shapes=[pltpu.VMEM((tm_eff, H), jnp.float32)],
        ),
        compiler_params=pltpu.CompilerParams(
            dimension_semantics=dims,
            vmem_limit_bytes=vmem_limit),
        cost_estimate=cost,
    )(x2, w1b, b1_2, w2b, b2_2, g_2, be_2)

    return out[:M].reshape(B, S, H)


if __name__ == "__main__":
    def reference(x, w1, b1, w2, b2, gamma, beta):
        B, S, H = x.shape
        x2 = x.reshape(-1, H).astype(jnp.float32)
        h = x2 @ w1 + b1
        h = h * 0.5 * (1.0 + lax.erf(h / math.sqrt(2.0)))
        h = h @ w2 + b2
        h = h + x2
        u = h.mean(-1, keepdims=True)
        s = ((h - u) ** 2).mean(-1, keepdims=True)
        h = (h - u) / jnp.sqrt(s + 1e-12)
        return (gamma * h + beta).reshape(B, S, H)

    def make_params(key, B, S, H):
        H4 = 4 * H
        kx, kw1, kb1, kw2, kb2, kg, kb = jax.random.split(key, 7)
        x = jax.random.normal(kx, (B, S, H), jnp.float32)
        bound1 = 1.0 / math.sqrt(H)
        w1 = jax.random.uniform(kw1, (H, H4), jnp.float32, -bound1, bound1)
        b1 = jax.random.uniform(kb1, (H4,), jnp.float32, -bound1, bound1)
        bound2 = 1.0 / math.sqrt(H4)
        w2 = jax.random.uniform(kw2, (H4, H), jnp.float32, -bound2, bound2)
        b2 = jax.random.uniform(kb2, (H,), jnp.float32, -bound2, bound2)
        gamma = jax.random.uniform(kg, (H,), jnp.float32, 0.5, 1.5)
        beta = jax.random.uniform(kb, (H,), jnp.float32, -0.1, 0.1)
        return x, w1, b1, w2, b2, gamma, beta

    key = jax.random.PRNGKey(0)
    k1, k2 = jax.random.split(key)

    # Case 1: hidden=32 -> resident-weight path (auto) + forced streaming path.
    args_small = make_params(k1, 2, 8, 32)
    ref_small = reference(*args_small)
    out_a = intermediate_forward(*args_small)
    jax.block_until_ready(out_a)
    out_b = intermediate_forward(*args_small, stream_weights=True)
    jax.block_until_ready(out_b)

    # Case 2: hidden=256 -> multi-chunk inner loop and 2-D (rows x 4H) grid.
    args_big = make_params(k2, 2, 64, 256)
    ref_big = reference(*args_big)
    out_c = intermediate_forward(*args_big)
    jax.block_until_ready(out_c)
    out_d = intermediate_forward(*args_big, stream_weights=True)
    jax.block_until_ready(out_d)

    for name, got, want in [("resident/H32", out_a, ref_small),
                            ("streamed/H32", out_b, ref_small),
                            ("resident/H256", out_c, ref_big),
                            ("streamed/H256", out_d, ref_big)]:
        err = float(jnp.max(jnp.abs(got - want)))
        assert jnp.allclose(got, want, atol=5e-2, rtol=5e-2), (name, err)

    print("KERNEL_OK")
</pallas_src>

<mosaic_0001>
module attributes {stable_mosaic.version = 11 : i64} {
  func.func @kernel(%arg0: i32, %arg1: memref<8x32xf32, #tpu.memory_space<vmem>>, %arg2: memref<32x128xbf16, #tpu.memory_space<vmem>>, %arg3: memref<1x128xf32, #tpu.memory_space<vmem>>, %arg4: memref<128x32xbf16, #tpu.memory_space<vmem>>, %arg5: memref<1x32xf32, #tpu.memory_space<vmem>>, %arg6: memref<1x32xf32, #tpu.memory_space<vmem>>, %arg7: memref<1x32xf32, #tpu.memory_space<vmem>>, %arg8: memref<8x32xf32, #tpu.memory_space<vmem>>, %arg9: memref<8x32xf32, #tpu.memory_space<vmem>>) attributes {dimension_semantics = [#tpu.dimension_semantics<parallel>], iteration_bounds = array<i64: 2>, scalar_prefetch = 0 : i64, scratch_operands = 1 : i64, tpu.core_type = #tpu.core_type<tc>, window_params = [{transform_indices = @transform_0, window_bounds = array<i64: 8, 32>}, {pipeline_mode = #tpu.pipeline_mode<synchronous>, transform_indices = @transform_1, window_bounds = array<i64: 32, 128>}, {pipeline_mode = #tpu.pipeline_mode<synchronous>, transform_indices = @transform_2, window_bounds = array<i64: 1, 128>}, {pipeline_mode = #tpu.pipeline_mode<synchronous>, transform_indices = @transform_3, window_bounds = array<i64: 128, 32>}, {pipeline_mode = #tpu.pipeline_mode<synchronous>, transform_indices = @transform_4, window_bounds = array<i64: 1, 32>}, {pipeline_mode = #tpu.pipeline_mode<synchronous>, transform_indices = @transform_5, window_bounds = array<i64: 1, 32>}, {pipeline_mode = #tpu.pipeline_mode<synchronous>, transform_indices = @transform_6, window_bounds = array<i64: 1, 32>}, {transform_indices = @transform_7, window_bounds = array<i64: 8, 32>}]} {
    %c0 = arith.constant 0 : index
    %c0_0 = arith.constant 0 : index
    %0 = vector.load %arg1[%c0, %c0_0] : memref<8x32xf32, #tpu.memory_space<vmem>>, vector<8x32xf32>
    %1 = arith.truncf %0 : vector<8x32xf32> to vector<8x32xbf16>
    %c0_1 = arith.constant 0 : index
    %c0_2 = arith.constant 0 : index
    %2 = vector.load %arg5[%c0_1, %c0_2] : memref<1x32xf32, #tpu.memory_space<vmem>>, vector<1x32xf32>
    %3 = vector.broadcast %2 : vector<1x32xf32> to vector<8x32xf32>
    %4 = arith.addf %0, %3 : vector<8x32xf32>
    %c0_3 = arith.constant 0 : index
    %c0_4 = arith.constant 0 : index
    %5 = vector.load %arg9[%c0_3, %c0_4] : memref<8x32xf32, #tpu.memory_space<vmem>>, vector<8x32xf32>
    tpu.vector_store %arg9[%c0_3, %c0_4], %4 {strides = array<i32>} : memref<8x32xf32, #tpu.memory_space<vmem>>, vector<8x32xf32>,
    %c0_5 = arith.constant 0 : index
    %c0_6 = arith.constant 0 : index
    %6 = vector.load %arg2[%c0_5, %c0_6] : memref<32x128xbf16, #tpu.memory_space<vmem>>, vector<32x128xbf16>
    %cst = arith.constant dense<0.000000e+00> : vector<8x128xf32>
    %7 = tpu.matmul %1, %6, %cst {dimension_numbers = #tpu.dot_dimension_numbers<[1], [0], [0], [1], [0, 0, 1, 1], [], []>} : vector<8x32xbf16>, vector<32x128xbf16>, vector<8x128xf32> -> vector<8x128xf32>
    %c0_7 = arith.constant 0 : index
    %c0_8 = arith.constant 0 : index
    %8 = vector.load %arg3[%c0_7, %c0_8] : memref<1x128xf32, #tpu.memory_space<vmem>>, vector<1x128xf32>
    %9 = vector.broadcast %8 : vector<1x128xf32> to vector<8x128xf32>
    %10 = arith.addf %7, %9 : vector<8x128xf32>
    %cst_9 = arith.constant 5.000000e-01 : f32
    %11 = vector.broadcast %cst_9 : f32 to vector<8x128xf32>
    %12 = arith.mulf %10, %11 : vector<8x128xf32>
    %cst_10 = arith.constant 0.707106769 : f32
    %13 = vector.broadcast %cst_10 : f32 to vector<8x128xf32>
    %14 = arith.mulf %10, %13 : vector<8x128xf32>
    %15 = math.erf %14 : vector<8x128xf32>
    %cst_11 = arith.constant 1.000000e+00 : f32
    %16 = vector.broadcast %cst_11 : f32 to vector<8x128xf32>
    %17 = arith.addf %16, %15 : vector<8x128xf32>
    %18 = arith.mulf %12, %17 : vector<8x128xf32>
    %c0_12 = arith.constant 0 : index
    %c0_13 = arith.constant 0 : index
    %19 = vector.load %arg9[%c0_12, %c0_13] : memref<8x32xf32, #tpu.memory_space<vmem>>, vector<8x32xf32>
    %20 = arith.truncf %18 : vector<8x128xf32> to vector<8x128xbf16>
    %c0_14 = arith.constant 0 : index
    %c0_15 = arith.constant 0 : index
    %21 = vector.load %arg4[%c0_14, %c0_15] : memref<128x32xbf16, #tpu.memory_space<vmem>>, vector<128x32xbf16>
    %cst_16 = arith.constant dense<0.000000e+00> : vector<8x32xf32>
    %22 = tpu.matmul %20, %21, %cst_16 {dimension_numbers = #tpu.dot_dimension_numbers<[1], [0], [0], [1], [0, 0, 1, 1], [], []>} : vector<8x128xbf16>, vector<128x32xbf16>, vector<8x32xf32> -> vector<8x32xf32>
    %23 = arith.addf %19, %22 : vector<8x32xf32>
    %c0_17 = arith.constant 0 : index
    %c0_18 = arith.constant 0 : index
    %24 = vector.load %arg9[%c0_17, %c0_18] : memref<8x32xf32, #tpu.memory_space<vmem>>, vector<8x32xf32>
    tpu.vector_store %arg9[%c0_17, %c0_18], %23 {strides = array<i32>} : memref<8x32xf32, #tpu.memory_space<vmem>>, vector<8x32xf32>,
    %c0_19 = arith.constant 0 : index
    %c0_20 = arith.constant 0 : index
    %25 = vector.load %arg9[%c0_19, %c0_20] : memref<8x32xf32, #tpu.memory_space<vmem>>, vector<8x32xf32>
    %cst_21 = arith.constant dense<0.000000e+00> : vector<8xf32>
    %26 = vector.multi_reduction <add>, %25, %cst_21 [1] : vector<8x32xf32> to vector<8xf32>
    %27 = vector.shape_cast %26 : vector<8xf32> to vector<8x1xf32>
    %28 = arith.mulf %25, %25 : vector<8x32xf32>
    %cst_22 = arith.constant dense<0.000000e+00> : vector<8xf32>
    %29 = vector.multi_reduction <add>, %28, %cst_22 [1] : vector<8x32xf32> to vector<8xf32>
    %30 = vector.shape_cast %29 : vector<8xf32> to vector<8x1xf32>
    %cst_23 = arith.constant 3.125000e-02 : f32
    %31 = vector.broadcast %cst_23 : f32 to vector<8x1xf32>
    %32 = arith.mulf %27, %31 : vector<8x1xf32>
    %cst_24 = arith.constant 3.125000e-02 : f32
    %33 = vector.broadcast %cst_24 : f32 to vector<8x1xf32>
    %34 = arith.mulf %30, %33 : vector<8x1xf32>
    %35 = arith.mulf %32, %32 : vector<8x1xf32>
    %36 = arith.subf %34, %35 : vector<8x1xf32>
    %cst_25 = arith.constant 0.000000e+00 : f32
    %37 = vector.broadcast %cst_25 : f32 to vector<8x1xf32>
    %38 = arith.maximumf %36, %37 : vector<8x1xf32>
    %cst_26 = arith.constant 9.99999996E-13 : f32
    %39 = vector.broadcast %cst_26 : f32 to vector<8x1xf32>
    %40 = arith.addf %38, %39 : vector<8x1xf32>
    %41 = math.rsqrt %40 : vector<8x1xf32>
    %42 = vector.broadcast %32 : vector<8x1xf32> to vector<8x32xf32>
    %43 = arith.subf %25, %42 : vector<8x32xf32>
    %c0_27 = arith.constant 0 : index
    %c0_28 = arith.constant 0 : index
    %44 = vector.load %arg6[%c0_27, %c0_28] : memref<1x32xf32, #tpu.memory_space<vmem>>, vector<1x32xf32>
    %45 = vector.broadcast %44 : vector<1x32xf32> to vector<8x32xf32>
    %46 = vector.broadcast %41 : vector<8x1xf32> to vector<8x32xf32>
    %47 = arith.mulf %45, %46 : vector<8x32xf32>
    %48 = arith.mulf %43, %47 : vector<8x32xf32>
    %c0_29 = arith.constant 0 : index
    %c0_30 = arith.constant 0 : index
    %49 = vector.load %arg7[%c0_29, %c0_30] : memref<1x32xf32, #tpu.memory_space<vmem>>, vector<1x32xf32>
    %50 = vector.broadcast %49 : vector<1x32xf32> to vector<8x32xf32>
    %51 = arith.addf %48, %50 : vector<8x32xf32>
    %c0_31 = arith.constant 0 : index
    %c0_32 = arith.constant 0 : index
    %52 = vector.load %arg8[%c0_31, %c0_32] : memref<8x32xf32, #tpu.memory_space<vmem>>, vector<8x32xf32>
    tpu.vector_store %arg8[%c0_31, %c0_32], %51 {strides = array<i32>} : memref<8x32xf32, #tpu.memory_space<vmem>>, vector<8x32xf32>,
    return
  }
  func.func @transform_0(%arg0: i32) -> (i32, i32) {
    %c0_i32 = arith.constant 0 : i32
    %c0_i32_0 = arith.constant 0 : i32
    return %arg0, %c0_i32 : i32, i32
  }
  func.func @transform_1(%arg0: i32) -> (i32, i32) {
    %c0_i32 = arith.constant 0 : i32
    %c0_i32_0 = arith.constant 0 : i32
    %c0_i32_1 = arith.constant 0 : i32
    return %c0_i32, %c0_i32_0 : i32, i32
  }
  func.func @transform_2(%arg0: i32) -> (i32, i32) {
    %c0_i32 = arith.constant 0 : i32
    %c0_i32_0 = arith.constant 0 : i32
    %c0_i32_1 = arith.constant 0 : i32
    return %c0_i32, %c0_i32_0 : i32, i32
  }
  func.func @transform_3(%arg0: i32) -> (i32, i32) {
    %c0_i32 = arith.constant 0 : i32
    %c0_i32_0 = arith.constant 0 : i32
    %c0_i32_1 = arith.constant 0 : i32
    return %c0_i32, %c0_i32_0 : i32, i32
  }
  func.func @transform_4(%arg0: i32) -> (i32, i32) {
    %c0_i32 = arith.constant 0 : i32
    %c0_i32_0 = arith.constant 0 : i32
    %c0_i32_1 = arith.constant 0 : i32
    return %c0_i32, %c0_i32_0 : i32, i32
  }
  func.func @transform_5(%arg0: i32) -> (i32, i32) {
    %c0_i32 = arith.constant 0 : i32
    %c0_i32_0 = arith.constant 0 : i32
    %c0_i32_1 = arith.constant 0 : i32
    return %c0_i32, %c0_i32_0 : i32, i32
  }
  func.func @transform_6(%arg0: i32) -> (i32, i32) {
    %c0_i32 = arith.constant 0 : i32
    %c0_i32_0 = arith.constant 0 : i32
    %c0_i32_1 = arith.constant 0 : i32
    return %c0_i32, %c0_i32_0 : i32, i32
  }
  func.func @transform_7(%arg0: i32) -> (i32, i32) {
    %c0_i32 = arith.constant 0 : i32
    %c0_i32_0 = arith.constant 0 : i32
    return %arg0, %c0_i32 : i32, i32
  }
}

</mosaic_0001>

<bundles_post_ra>
// kernel: intermediate_forward.1
= control target key start
LH: loop header
LB: loop body
LE: loop exit
PB: predicated region body
PF: predicated region fallthrough
CT: control target
= control target key end

     0   :  { %12 = vsyncpa [#allocation4], 0  ;;  %s948_s0 = inlined_call_operand.vmem [shape: f32[16,32], index: 0, kind: input, shape index: {}]   ;;  %s949_s1 = inlined_call_operand.vmem [shape: bf16[32,128], index: 1, kind: input, shape index: {}]   ;;  %s950_s2 = inlined_call_operand.vmem [shape: f32[1,128], index: 2, kind: input, shape index: {}]   ;;  %s951_s3 = inlined_call_operand.vmem [shape: bf16[128,32], index: 3, kind: input, shape index: {}]   ;;  %s952_s4 = inlined_call_operand.vmem [shape: f32[1,32], index: 4, kind: input, shape index: {}]   ;;  %s953_s5 = inlined_call_operand.vmem [shape: f32[1,32], index: 5, kind: input, shape index: {}]   ;;  %s954_s6 = inlined_call_operand.vmem [shape: f32[1,32], index: 6, kind: input, shape index: {}]   ;;  %s955_s7 = inlined_call_operand.hbm [shape: f32[16,32], index: 7, kind: output, shape index: {}]  }
   0x1   :  { %14 = vsyncpa [#allocation4 + $0x1], 0  ;;  %s800_s24 = smov 0   ;;  %s802_s25 = smov 0  }
   0x2   :  { %s804_s26 = smov 0   ;;  %s806_s27 = smov 0  }
   0x3 LB: > { %s821_s28 = sadd.s32 4294967295, %s755_s27   ;;  %s573_s29 = sadd.s32 4294967294, %s755_s27   ;;  %s755_s27 = sphi %s806_s27, %s961_s27   ;;  %s751_s26 = sphi %s804_s26, %s960_s26   ;;  %s747_s25 = sphi %s802_s25, %s959_s25   ;;  %s743_s24 = sphi %s800_s24, %s958_s24  }
   0x4   : > { %s825_s30 = sadd.s32 1, %s755_s27   ;;  %s179_s8 = sadd.s32 1, %s751_s26 }
   0x5   : > { %s176_s9 = ssub.s32 %s755_s27, %s825_s30  ;;  %p189_p0 = scmp.ne.s32.totalorder %s751_s26, %s747_s25 }
   0x6   : > { %p177_p1 = scmp.eq.s32.totalorder %s176_s9, 0  ;;  %p190_p2 = scmp.eq.s32.totalorder %s821_s28, 1 }
   0x7   : > { %p195_p3 = scmp.ne.s32.totalorder %s747_s25, %s743_s24  ;;  %p196_p4 = scmp.eq.s32.totalorder %s573_s29, 1 }
   0x8   : > { %s836_s10 = scalar_select %p177_p1, %s751_s26, %s179_s8  }
   0x9   : > { %p838_p5 = por %p190_p2, %p189_p0  ;;  %p842_p6 = por %p196_p4, %p195_p3 }
   0xa   : > { %p576_p7 = scmp.ge.s32.totalorder %s755_s27, 1  ;;  %p239_p8 = scmp.lt.s32.totalorder %s755_s27, 3 }
   0xc   : > { %p240_p9 = pnand %p576_p7, %p239_p8 }
   0xd   : > { %v679_v0 = vld [vmem:[%s949_s1] sm:$0xff] (!%p240_p9)   ;;  %v757_v1 = vmov (!%p240_p9), 0.0   ;;  %v680_v2 = vld [vmem:[%s949_s1 + $0x8] sm:$0xff] (!%p240_p9)   ;;  %vm758_vm0 = vmmov (!%p240_p9), 0   ;;  %p270_p10 = scmp.lt.s32.totalorder (!%p240_p9), %s821_s28, 1  ;;  %v683_v6 = vld [vmem:[%s951_s3 + $0x10] sm:$0xff] (!%p240_p9)  }
   0xe   : > { %243 = sbr.rel (%p240_p9) target bundleno = 669 (0x29d), region = 48  ;;  %610 = vmatprep.subr.bf16.mxu0 (!%p240_p9), %v757_v1  ;;  %618 = vmatprep.subr.bf16.mxu1 (!%p240_p9), %v757_v1  ;;  %v681_v3 = vld [vmem:[%s951_s3] sm:$0xff] (!%p240_p9)   ;;  %v682_v5 = vld [vmem:[%s951_s3 + $0x8] sm:$0xff] (!%p240_p9)   ;;  %vm285_vm1 = vcmask (!%p240_p9), 261120   ;;  %v684_v10 = vld [vmem:[%s951_s3 + $0x18] sm:$0xff] (!%p240_p9)   ;;  %s267_s14 = sand.u32 (!%p240_p9), 1, %s747_s25  }
   0xf   : > { %611 = vmatpush3.bf16.msra.mxu0 (!%p240_p9), %v679_v0  ;;  %614 = vmatprep.mubr.msk.bf16.mxu0 (!%p240_p9), %vm758_vm0, %v757_v1  ;;  %v579_v4 = vld [vmem:[%s952_s4] ss:$0 sm:$0xff] (!%p240_p9)  ;;  %v686_v12 = vld [vmem:[%s951_s3 + $0x28] sm:$0xff] (!%p240_p9)   ;;  %v687_v13 = vld [vmem:[%s951_s3 + $0x30] sm:$0xff] (!%p240_p9)   ;;  %s577_s15 = sshll.u32 (!%p240_p9), %s267_s14, 3  ;;  %s595_s20 = sshll.u32 (!%p240_p9), %s821_s28, 7 }
  0x10   : > { %612 = vmatprep.subr.bf16.mxu0 (!%p240_p9), %v757_v1  ;;  %634 = vmatprep.mubr.msk.bf16.mxu1 (!%p240_p9), %vm758_vm0, %v757_v1  ;;  %v685_v11 = vld [vmem:[%s951_s3 + $0x20] sm:$0xff] (!%p240_p9)   ;;  %v688_v14 = vld [vmem:[%s951_s3 + $0x38] sm:$0xff] (!%p240_p9)   ;;  %s269_s21 = scalar_lea.vmem (!%p240_p9), [#allocation3], %s577_s15  ;;  %s905_s8 = scalar_lea.hbm (!%p240_p9), %s955_s7, %s595_s20 }
  0x11   : > { %619 = vmatpush3.bf16.msra.mxu1 (!%p240_p9), %v681_v3  ;;  %v580_v15 = vld [vmem:[%s950_s2] ss:$0 sm:$0xff] (!%p240_p9)  ;;  %s514_s22 = sshll.u32 (!%p240_p9), %s269_s21, 4  ;;  %s501_s9 = scalar_lea.sflag (!%p240_p9), [#allocation4], %s267_s14  ;;  %s907_s22 = int_to_ptr.vmem [resolvable:$true] %s514_s22 }
  0x12   : > { %620 = vmatprep.subr.bf16.mxu1 (!%p240_p9), %v757_v1  ;;  %v592_v45 = vld [vmem:[%s953_s5] ss:$0 sm:$0xff] (!%p240_p9) }
  0x13   : > { %613 = vmatpush3.bf16.msra.mxu0 (!%p240_p9), %v680_v2  ;;  %v593_v49 = vld [vmem:[%s954_s6] ss:$0 sm:$0xff] (!%p240_p9) }
  0x15   : > { %s271_s19 = scalar_select %p270_p10, %s821_s28, 1  ;;  %621 = vmatpush3.bf16.msra.mxu1 %v682_v5 }
  0x16   : > { %622 = vmatprep.subr.bf16.mxu1 %v757_v1  ;;  %s759_s28 = smov [#allocation3]  }
  0x17   : > { %s578_s29 = sshll.u32 %s271_s19, 3  ;;  %s697_s15 = sshll.u32 %s759_s28, 4  ;;  %s698_s15 = int_to_ptr.vmem [resolvable:$false] %s697_s15 }
  0x18   : > { %s273_s13 = scalar_lea.vmem %s948_s0, %s578_s29  ;;  %s699_s16 = scalar_lea.vmem %s698_s15, 256 }
  0x19   : > { %v275_v7 = vld [vmem:[%s273_s13] sm:$0xff]  ;;  %623 = vmatpush3.bf16.msra.mxu1 %v683_v6  ;;  %s693_s13 = scalar_lea.vmem %s907_s22, 128  ;;  %p700_p0 = scmp.lt.s32.totalorder %s907_s22, %s698_s15 }
  0x1a   : > { %v276_v8 = vpack.c.bf16 %v275_v7, %v275_v7  ;;  %v284_v9 = vadd.f32 %v579_v4, %v275_v7  ;;  %624 = vmatprep.subr.bf16.mxu1 %v757_v1  ;;  %p694_p11 = scmp.ne.s32.totalorder %s907_s22, %s693_s13  ;;  %p701_p1 = scmp.lt.s32.totalorder %s699_s16, %s693_s13 }
  0x1c   : > { %615 = vmatmul.mubr.msk.bf16.vlgmr.msra.gmra.mrb[0].mxu0 %vm285_vm1, %v276_v8  ;;  %286 = vst.msk [vmem:[#allocation2] sm:$0xff] %vm285_vm1, %v284_v9  ;;  %p695_p12 = pnand %p694_p11, %p838_p5  ;;  %p702_p2 = por %p701_p1, %p700_p0 }
  0x1d   : > { %625 = vmatpush3.bf16.msra.mxu1 %v684_v10 }
  0x1e   : > { %626 = vmatprep.subr.bf16.mxu1 %v757_v1  ;;  %p696_p13 = pneg %p695_p12 }
  0x20   : > { %p703_p3 = pnand %p702_p2, %p696_p13 }
  0x21   : > { %627 = vmatpush3.bf16.msra.mxu1 %v685_v11 }
  0x22   : > { %628 = vmatprep.subr.bf16.mxu1 %v757_v1 }
  0x23   : > { %v358_v27 = vld [vmem:[#allocation2] sm:$0xff] }
  0x25   : > { %629 = vmatpush3.bf16.msra.mxu1 %v686_v12 }
  0x26   : > { %630 = vmatprep.subr.bf16.mxu1 %v757_v1 }
  0x29   : > { %631 = vmatpush3.bf16.msra.mxu1 %v687_v13 }
  0x2a   : > { %632 = vmatprep.subr.bf16.mxu1 %v757_v1 }
  0x2d   : > { %633 = vmatpush3.bf16.msra.mxu1 %v688_v14 }
  0xef   : > { %v347_v16 = vpop.f32.mrb[0].mxu0 }
  0xf0   : > { %v348_v17 = vadd.f32 %v580_v15, %v347_v16  ;;  %v616_v18 = vpop.f32.mrb[1].mxu0 }
  0xf1   : > { %v350_v19 = vpop.f32.mrb[2].mxu0 }
  0xf2   : > { %v354_v20 = vmul.f32 0.70710677, %v348_v17  ;;  %v617_v21 = vpop.f32.mrb[3].mxu0  ;;  %v353_v23 = vmul.f32 0.5, %v348_v17 }
  0xf4   : > { %689 = verf.f32 %v354_v20 }
  0xfe   : > { %v690_v22 = vpop.eup %689 }
  0xff   : > { %v356_v24 = vadd.f32 1.0, %v690_v22 }
 0x101   : > { %v357_v25 = vmul.f32 %v356_v24, %v353_v23 }
 0x103   : > { %v359_v26 = vpack.c.bf16 %v357_v25, %v357_v25 }
 0x105   : > { %635 = vmatmul.mubr.bf16.vlgmr.msra.gmra.mrb[0].mxu1 %v359_v26 }
 0x1d8   : > { %v458_v28 = vpop.f32.mrb[0].mxu1 }
 0x1d9   : > { %v464_v29 = vadd.f32 %v458_v28, %v358_v27  ;;  %v636_v30 = vpop.f32.mrb[1].mxu1 }
 0x1da   : > { %v461_v31 = vpop.f32.mrb[2].mxu1 }
 0x1db   : > { %465 = vst.msk [vmem:[#allocation2] sm:$0xff] %vm285_vm1, %v464_v29  ;;  %v637_v32 = vpop.f32.mrb[3].mxu1 }
 0x1e2   : > { %v466_v33 = vld [vmem:[#allocation2] sm:$0xff] }
 0x1e3   : > { %v467_v34 = vsel %vm285_vm1, %v466_v33, 0.0  ;;  %v470_v35 = vmul.f32 %v466_v33, %v466_v33 }
 0x1e4   : > { %468 = vadd.xlane.f32.xlu0 %v467_v34 }
 0x1e5   : > { %v471_v36 = vsel %vm285_vm1, %v470_v35, 0.0 }
 0x1e8   : > { %472 = vadd.xlane.f32.xlu0 %v471_v36 }
 0x271   : > { %v469_v37 = vpop.xlane.xlu0 %468 }
 0x272   : > { %v474_v38 = vmul.f32 0.03125, %v469_v37 }
 0x274   : > { %v476_v40 = vmul.f32 %v474_v38, %v474_v38  ;;  %v481_v47 = vsub.f32 %v466_v33, %v474_v38 }
 0x275   : > { %v473_v39 = vpop.xlane.xlu0 %472 }
 0x276   : > { %v475_v41 = vmul.f32 0.03125, %v473_v39 }
 0x278   : > { %v477_v42 = vsub.f32 %v475_v41, %v476_v40 }
 0x27a   : > { %v478_v43 = vmax.f32 %v477_v42, 0.0 }
 0x27c   : > { %v479_v44 = vadd.f32 1e-12, %v478_v43 }
 0x27e   : > { %691 = vrsqrt.f32 %v479_v44 }
 0x288   : > { %v692_v46 = vpop.eup %691 }
 0x289   : > { %v489_v48 = vmul.f32 %v692_v46, %v592_v45 }
 0x28b   : > { %v490_v50 = vmul.f32 %v489_v48, %v481_v47 }
 0x28d   : > { %v498_v51 = vadd.f32 %v593_v49, %v490_v50 }
 0x28f   : > { %499 = vst.msk [vmem:[%s269_s21] sm:$0xff] %vm285_vm1, %v498_v51 }
 0x290   : > { %706 = shalt.err (!%p703_p3)
}
 0x291   : > { %s707_s14 = scalar_lea.hbm %s905_s8, 128  ;;  %s711_s19 = scalar_lea.hbm %s955_s7, 256 }
 0x292   : > { %p708_p4 = scmp.ne.s32.totalorder %s905_s8, %s707_s14  ;;  %p712_p9 = scmp.lt.u32.totalorder %s905_s8, %s955_s7 }
 0x293   : > { %p713_p10 = scmp.lt.u32.totalorder %s711_s19, %s707_s14  ;;  %p715_p12 = scmp.lt.u32.totalorder %s707_s14, %s905_s8 }
 0x294   : > { %p709_p7 = pnand %p708_p4, %p838_p5 }
 0x295   : > { %p714_p11 = por %p713_p10, %p712_p9 }
 0x296   : > { %p710_p8 = pneg %p709_p7 }
 0x297   : > { %p716_p13 = por %p715_p12, %p714_p11 }
 0x299   : > { %p717_p0 = pnand %p716_p13, %p710_p8 }
 0x29b   : > { %720 = shalt.err (!%p717_p0)
}
 0x29c   : > { %638 = dma.vmem_to_hbm [thread:$0]  (%p838_p5), %s907_s22, 128, %s905_s8, %s501_s9  }
 0x29d PF: > { %p644_p1 = scmp.ge.s32.totalorder %s755_s27, 2  ;;  %s526_s23 = sand.u32 1, %s743_s24  }
 0x29e   : > { %s527_s29 = scalar_lea.sflag [#allocation4], %s526_s23 }
 0x29f   : > { %p641_p2 = pnand %p644_p1, %p842_p6 }
 0x2a1   : > { %738 = dma.done.wait (!%p641_p2), %s527_s29, 128  }
 0x2a2   : > { %740 = vsyncadd (!%p641_p2), %s527_s29, 4294967168  ;;  %p17_p3 = scmp.ge.s32.totalorder %s825_s30, 4   ;;  %s958_s24 = smov %s747_s25 }
 0x2a3   : > { %s959_s25 = smov %s751_s26  ;;  %s960_s26 = smov %s836_s10 }
 0x2a4   : > { %s961_s27 = smov %s825_s30  ;;  %19 = sbr.rel (!%p17_p3) target bundleno = 3 (0x3), region = 83 }
 0x2ab   :  { %532 = vsyncpa [#allocation4], 1 }
 0x2ac   :  { %534 = vsyncpa [#allocation4 + $0x1], 1 }

</bundles_post_ra>
